<compile_context>
chip_gen: v7x
topology: tpu7x:2x2x1
jax: 0.10.0
libtpu: 0.0.40
codegen_flags: <defaults>
</compile_context>

<pallas_src>
import functools

import jax
import jax.numpy as jnp
from jax.experimental import pallas as pl
from jax.experimental.pallas import tpu as pltpu


def _round_up(x: int, m: int) -> int:
    return ((x + m - 1) // m) * m


def _cdiv(a: int, b: int) -> int:
    return (a + b - 1) // b


def _vmem_capacity_bytes() -> int:
    try:
        return int(pltpu.get_tpu_info().vmem_capacity_bytes)
    except Exception:
        return 64 * 1024 * 1024  # conservative (v7x per-core VMEM)


def _myloss_kernel(pred_ref, lab_ref, out_ref, acc_ref, *,
                   n_rows: int, tile_rows: int, blocks_per_split: int,
                   needs_mask: bool):
    """One batch tile: hinge margin, per-row max (vs. implicit zeros), partial sum."""
    p = pl.program_id(0)   # parallel core-split axis
    i = pl.program_id(1)   # arbitrary (reduction) axis

    @pl.when(i == 0)
    def _init():
        acc_ref[...] = jnp.zeros_like(acc_ref)

    # Upcast in-kernel so narrow inputs travel HBM->VMEM at native width.
    o = pred_ref[...].astype(jnp.float32)                 # (tn, C)
    lab = lab_ref[...].astype(jnp.float32)                # (tn, C)
    tem_loss = 1.0 - o * lab                              # hinge margin

    # max over dim=1 of cat((tem_loss, zeros), 1) == max(max_c(tem_loss), 0)
    row_max = jnp.max(tem_loss, axis=1, keepdims=True)    # (tn, 1)
    hinged = jnp.maximum(row_max, 0.0)                    # clamp vs. concat'd zeros

    if needs_mask:
        blk = p * blocks_per_split + i                    # intended global block idx
        is_partial = (blk + 1) * tile_rows > n_rows       # ragged or OOB block

        @pl.when(is_partial)
        def _acc_masked():
            row_ids = blk * tile_rows + jax.lax.broadcasted_iota(
                jnp.int32, (tile_rows, 1), 0)
            acc_ref[...] += jnp.where(row_ids < n_rows, hinged, 0.0)

        @pl.when(jnp.logical_not(is_partial))
        def _acc_full():
            acc_ref[...] += hinged
    else:
        acc_ref[...] += hinged

    @pl.when(i == pl.num_programs(1) - 1)
    def _finalize():
        # Single cross-sublane reduce per split; broadcast into the (8, 128)
        # lane-dense output block (unmasked vst), wrapper reads element [0, 0].
        total = jnp.sum(acc_ref[...])
        out_ref[...] = jnp.full(out_ref.shape, total, dtype=jnp.float32)


def myloss(output: jax.Array, label: jax.Array, *,
           max_tile_rows: int = 8192) -> jax.Array:
    """Pallas equivalent of Myloss.forward(output, label). Returns scalar f32."""
    assert output.shape == label.shape and output.ndim == 2
    n, c = output.shape
    o_item = jnp.dtype(output.dtype).itemsize
    l_item = jnp.dtype(label.dtype).itemsize

    c_pad = _round_up(c, 128)
    # dtype-native sublane multiple: 8 for 4-byte, 16 for 2-byte, 32 for 1-byte.
    sub = 32 // min(o_item, l_item)

    # Generation-aware tile budget: ~32 MiB on v5e/v6e (128 MiB VMEM),
    # ~16 MiB on v7x (64 MiB VMEM), never below 4 MiB.
    vmem_cap = _vmem_capacity_bytes()
    tile_budget = max(4 << 20, min(32 << 20, vmem_cap // 4))
    # 2 pipeline buffers per input + single-buffered (tn, 1) f32 scratch (lane-padded).
    bytes_per_row = 2 * c_pad * (o_item + l_item) + 128 * 4
    rows_budget = max(sub, tile_budget // bytes_per_row)

    tn = min(max_tile_rows, rows_budget, _round_up(n, sub))
    tn = max(sub, (tn // sub) * sub)

    total_blocks = _cdiv(n, tn)
    n_splits = 2 if total_blocks >= 2 else 1       # v7x: one split per TensorCore
    blocks_per_split = _cdiv(total_blocks, n_splits)
    grid = (n_splits, blocks_per_split)
    needs_mask = (n % tn != 0) or (total_blocks % n_splits != 0)

    def in_index_map(p_idx, i_idx):
        blk = p_idx * blocks_per_split + i_idx
        # Clamp fully-OOB tail blocks (odd block count split over 2 cores);
        # their rows are masked to zero in-kernel so the data read is irrelevant.
        return (jnp.minimum(blk, total_blocks - 1), 0)

    kernel = functools.partial(
        _myloss_kernel, n_rows=n, tile_rows=tn,
        blocks_per_split=blocks_per_split, needs_mask=needs_mask)

    footprint = tn * bytes_per_row + (64 << 10)
    vmem_limit = int(min(vmem_cap * 3 // 4, max(2 * footprint, 32 << 20)))

    # Lane-padded footprint == real DMA volume for tiny C.
    bytes_accessed = n * c_pad * (o_item + l_item) + n_splits * 8 * 128 * 4

    partials = pl.pallas_call(
        kernel,
        out_shape=jax.ShapeDtypeStruct((8 * n_splits, 128), jnp.float32),
        grid_spec=pltpu.PrefetchScalarGridSpec(
            num_scalar_prefetch=0,
            grid=grid,
            in_specs=[
                pl.BlockSpec((tn, c), in_index_map),
                pl.BlockSpec((tn, c), in_index_map),
            ],
            out_specs=pl.BlockSpec((8, 128), lambda p_idx, i_idx: (p_idx, 0)),
            scratch_shapes=[pltpu.VMEM((tn, 1), jnp.float32)],
        ),
        compiler_params=pltpu.CompilerParams(
            dimension_semantics=("parallel", "arbitrary"),
            vmem_limit_bytes=vmem_limit,
        ),
        cost_estimate=pl.CostEstimate(
            flops=3 * n * c, transcendentals=0, bytes_accessed=bytes_accessed),
    )(output, label)

    # Sum the per-core partials and apply the mean in the wrapper.
    per_split = partials.reshape(n_splits, 8, 128)[:, 0, 0]
    return jnp.sum(per_split) * jnp.float32(1.0 / n)


def _reference(output, label):
    tem_loss = 1.0 - output.astype(jnp.float32) * label.astype(jnp.float32)
    tmp = jnp.concatenate((tem_loss, jnp.zeros_like(tem_loss)), axis=1)
    return jnp.mean(jnp.max(tmp, axis=1))


if __name__ == "__main__":
    key = jax.random.PRNGKey(0)
    k1, k2, k3, k4, k5, k6 = jax.random.split(key, 6)

    def make_labels(k, shape, dtype=jnp.float32):
        s = jnp.sign(jax.random.normal(k, shape))
        s = jnp.where(s == 0, 1.0, s)
        return s.astype(dtype)

    # Case 1: small classifier-head shape (single tile, single grid step).
    N, C = 16, 4
    out1 = jax.random.normal(k1, (N, C), dtype=jnp.float32)
    lab1 = make_labels(k2, (N, C))
    loss1 = myloss(out1, lab1)
    jax.block_until_ready(loss1)
    ref1 = _reference(out1, lab1)
    assert jnp.allclose(loss1, ref1, atol=1e-5, rtol=1e-5), (loss1, ref1)

    # Case 2: ragged batch + multi-step grid, forces the 2-split parallel axis,
    # OOB-block clamp and last-block row masking (37 rows, tn=8 -> 5 blocks).
    N2, C2 = 37, 4
    out2 = jax.random.normal(k3, (N2, C2), dtype=jnp.float32)
    lab2 = make_labels(k4, (N2, C2))
    loss2 = myloss(out2, lab2, max_tile_rows=8)
    jax.block_until_ready(loss2)
    ref2 = _reference(out2, lab2)
    assert jnp.allclose(loss2, ref2, atol=1e-5, rtol=1e-5), (loss2, ref2)

    # Case 3: bf16 (+/-1) labels — narrower HBM stream, 16-row sublane rounding,
    # in-kernel upcast; predictions stay f32.
    N3, C3 = 100, 3
    out3 = jax.random.normal(k5, (N3, C3), dtype=jnp.float32)
    lab3 = make_labels(k6, (N3, C3), dtype=jnp.bfloat16)
    loss3 = myloss(out3, lab3)
    jax.block_until_ready(loss3)
    ref3 = _reference(out3, lab3)
    assert jnp.allclose(loss3, ref3, atol=1e-5, rtol=1e-5), (loss3, ref3)

    print("KERNEL_OK")
</pallas_src>

<mosaic_0001>
module attributes {stable_mosaic.version = 11 : i64} {
  func.func @_myloss_kernel(%arg0: i32, %arg1: i32, %arg2: memref<16x4xf32, #tpu.memory_space<vmem>>, %arg3: memref<16x4xf32, #tpu.memory_space<vmem>>, %arg4: memref<8x128xf32, #tpu.memory_space<vmem>>, %arg5: memref<16x1xf32, #tpu.memory_space<vmem>>) attributes {dimension_semantics = [#tpu.dimension_semantics<parallel>, #tpu.dimension_semantics<arbitrary>], iteration_bounds = array<i64: 1, 1>, scalar_prefetch = 0 : i64, scratch_operands = 1 : i64, tpu.core_type = #tpu.core_type<tc>, window_params = [{transform_indices = @transform_0, window_bounds = array<i64: 16, 4>}, {transform_indices = @transform_1, window_bounds = array<i64: 16, 4>}, {transform_indices = @transform_2, window_bounds = array<i64: 8, 128>}]} {
    %c0_i32 = arith.constant 0 : i32
    %0 = arith.cmpi eq, %arg1, %c0_i32 : i32
    %1 = arith.extui %0 : i1 to i32
    %c0_i32_0 = arith.constant 0 : i32
    %2 = arith.cmpi ne, %1, %c0_i32_0 : i32
    scf.if %2 {
      %cst_12 = arith.constant 0.000000e+00 : f32
      %18 = vector.broadcast %cst_12 : f32 to vector<16x1xf32>
      %c0_13 = arith.constant 0 : index
      %c0_14 = arith.constant 0 : index
      %19 = vector.load %arg5[%c0_13, %c0_14] : memref<16x1xf32, #tpu.memory_space<vmem>>, vector<16x1xf32>
      tpu.vector_store %arg5[%c0_13, %c0_14], %18 {strides = array<i32>} : memref<16x1xf32, #tpu.memory_space<vmem>>, vector<16x1xf32>,
    } else {
    }
    %c0 = arith.constant 0 : index
    %c0_1 = arith.constant 0 : index
    %3 = vector.load %arg2[%c0, %c0_1] : memref<16x4xf32, #tpu.memory_space<vmem>>, vector<16x4xf32>
    %c0_2 = arith.constant 0 : index
    %c0_3 = arith.constant 0 : index
    %4 = vector.load %arg3[%c0_2, %c0_3] : memref<16x4xf32, #tpu.memory_space<vmem>>, vector<16x4xf32>
    %5 = arith.mulf %3, %4 : vector<16x4xf32>
    %cst = arith.constant 1.000000e+00 : f32
    %6 = vector.broadcast %cst : f32 to vector<16x4xf32>
    %7 = arith.subf %6, %5 : vector<16x4xf32>
    %cst_4 = arith.constant dense<0xFF800000> : vector<16xf32>
    %8 = vector.multi_reduction <maximumf>, %7, %cst_4 [1] : vector<16x4xf32> to vector<16xf32>
    %9 = vector.shape_cast %8 : vector<16xf32> to vector<16x1xf32>
    %cst_5 = arith.constant 0.000000e+00 : f32
    %10 = vector.broadcast %cst_5 : f32 to vector<16x1xf32>
    %11 = arith.maximumf %9, %10 : vector<16x1xf32>
    %c0_6 = arith.constant 0 : index
    %c0_7 = arith.constant 0 : index
    %12 = vector.load %arg5[%c0_6, %c0_7] : memref<16x1xf32, #tpu.memory_space<vmem>>, vector<16x1xf32>
    %13 = arith.addf %12, %11 : vector<16x1xf32>
    %c0_8 = arith.constant 0 : index
    %c0_9 = arith.constant 0 : index
    %14 = vector.load %arg5[%c0_8, %c0_9] : memref<16x1xf32, #tpu.memory_space<vmem>>, vector<16x1xf32>
    tpu.vector_store %arg5[%c0_8, %c0_9], %13 {strides = array<i32>} : memref<16x1xf32, #tpu.memory_space<vmem>>, vector<16x1xf32>,
    %c0_i32_10 = arith.constant 0 : i32
    %15 = arith.cmpi eq, %arg1, %c0_i32_10 : i32
    %16 = arith.extui %15 : i1 to i32
    %c0_i32_11 = arith.constant 0 : i32
    %17 = arith.cmpi ne, %16, %c0_i32_11 : i32
    scf.if %17 {
      %c0_12 = arith.constant 0 : index
      %c0_13 = arith.constant 0 : index
      %18 = vector.load %arg5[%c0_12, %c0_13] : memref<16x1xf32, #tpu.memory_space<vmem>>, vector<16x1xf32>
      %19 = vector.shape_cast %18 : vector<16x1xf32> to vector<1x16x1xf32>
      %cst_14 = arith.constant dense<0.000000e+00> : vector<1xf32>
      %20 = vector.multi_reduction <add>, %19, %cst_14 [1, 2] : vector<1x16x1xf32> to vector<1xf32>
      %21 = vector.shape_cast %20 : vector<1xf32> to vector<1x1x1xf32>
      %22 = vector.extract %21[0, 0, 0] : f32 from vector<1x1x1xf32>
      %23 = vector.broadcast %22 : f32 to vector<8x128xf32>
      %c0_15 = arith.constant 0 : index
      %c0_16 = arith.constant 0 : index
      %24 = vector.load %arg4[%c0_15, %c0_16] : memref<8x128xf32, #tpu.memory_space<vmem>>, vector<8x128xf32>
      tpu.vector_store %arg4[%c0_15, %c0_16], %23 {strides = array<i32>} : memref<8x128xf32, #tpu.memory_space<vmem>>, vector<8x128xf32>,
    } else {
    }
    return
  }
  func.func @transform_0(%arg0: i32, %arg1: i32) -> (i32, i32) {
    %c1_i32 = arith.constant 1 : i32
    %0 = arith.muli %arg0, %c1_i32 : i32
    %1 = arith.addi %0, %arg1 : i32
    %c0_i32 = arith.constant 0 : i32
    %2 = arith.minsi %1, %c0_i32 : i32
    %c0_i32_0 = arith.constant 0 : i32
    %c0_i32_1 = arith.constant 0 : i32
    return %2, %c0_i32_0 : i32, i32
  }
  func.func @transform_1(%arg0: i32, %arg1: i32) -> (i32, i32) {
    %c1_i32 = arith.constant 1 : i32
    %0 = arith.muli %arg0, %c1_i32 : i32
    %1 = arith.addi %0, %arg1 : i32
    %c0_i32 = arith.constant 0 : i32
    %2 = arith.minsi %1, %c0_i32 : i32
    %c0_i32_0 = arith.constant 0 : i32
    %c0_i32_1 = arith.constant 0 : i32
    return %2, %c0_i32_0 : i32, i32
  }
  func.func @transform_2(%arg0: i32, %arg1: i32) -> (i32, i32) {
    %c0_i32 = arith.constant 0 : i32
    %c0_i32_0 = arith.constant 0 : i32
    return %arg0, %c0_i32 : i32, i32
  }
}

</mosaic_0001>

<bundles_post_ra>
// kernel: tpu_custom_call.1
= control target key start
LH: loop header
LB: loop body
LE: loop exit
PB: predicated region body
PF: predicated region fallthrough
CT: control target
= control target key end

     0   :  { %s227_s0 = inlined_call_operand.vmem [shape: f32[16,4], index: 0, kind: input, shape index: {}]   ;;  %s228_s1 = inlined_call_operand.vmem [shape: f32[16,4], index: 1, kind: input, shape index: {}]   ;;  %s229_s2 = inlined_call_operand.hbm [shape: f32[8,128], index: 2, kind: output, shape index: {}]  }
   0x1   :  { %v83_v0 = vld [vmem:[%s227_s0] sm:$0xff]  ;;  %v84_v2 = vld [vmem:[%s227_s0 + $0x8] sm:$0xff] }
   0x2   :  { %v85_v1 = vld [vmem:[%s228_s1] sm:$0xff]  ;;  %v86_v4 = vld [vmem:[%s228_s1 + $0x8] sm:$0xff] }
   0x3   :  { %v87_v3 = vmul.f32 %v85_v1, %v83_v0 }
   0x4   :  { %7 = vsyncpa [#allocation4], 0  ;;  %vm91_vm0 = vcmask 31744   ;;  %v88_v5 = vmul.f32 %v86_v4, %v84_v2  ;;  %vm80_vm1 = vcmask 7168   ;;  %v180_v10 = vmov 0.0   ;;  %s181_s0 = smov [#allocation3]  }
   0x5   :  { %v89_v6 = vsub.f32 1.0, %v87_v3  ;;  %81 = vst.msk [vmem:[#allocation2] sm:$0xff] %vm80_vm1, %v180_v10  ;;  %82 = vst.msk [vmem:[#allocation2 + $0x8] sm:$0xff] %vm80_vm1, %v180_v10  ;;  %s132_s1 = sshll.u32 %s181_s0, 4  ;;  %s133_s1 = int_to_ptr.vmem [resolvable:$true] %s132_s1 }
   0x6   :  { %v90_v7 = vsub.f32 1.0, %v88_v5  ;;  %s156_s18 = scalar_lea.vmem %s133_s1, 128  ;;  %p161_p1 = scmp.lt.s32.totalorder %s133_s1, %s133_s1 }
   0x7   :  { %v92_v8 = vsel %vm91_vm0, %v89_v6, -inf  ;;  %p157_p0 = scmp.ne.s32.totalorder %s133_s1, %s156_s18  ;;  %p162_p2 = scmp.lt.s32.totalorder %s156_s18, %s156_s18 }
   0x8   :  { %93 = vmax.xlane.f32.xlu0 %v92_v8  ;;  %v95_v9 = vsel %vm91_vm0, %v90_v7, -inf }
   0x9   :  { %p163_p3 = por %p162_p2, %p161_p1 }
   0xb   :  { %p164_p4 = pnand %p163_p3, %p157_p0 }
   0xc   :  { %96 = vmax.xlane.f32.xlu0 %v95_v9  ;;  %v100_v12 = vld [vmem:[#allocation2] sm:$0xff]  ;;  %v101_v16 = vld [vmem:[#allocation2 + $0x8] sm:$0xff] }
  0x95   :  { %v94_v11 = vpop.xlane.xlu0 %93 }
  0x96   :  { %v98_v13 = vmax.f32 %v94_v11, 0.0 }
  0x98   :  { %v102_v14 = vadd.f32 %v100_v12, %v98_v13 }
  0x99   :  { %v97_v15 = vpop.xlane.xlu0 %96 }
  0x9a   :  { %105 = vst.msk [vmem:[#allocation2] sm:$0xff] %vm80_vm1, %v102_v14  ;;  %v99_v17 = vmax.f32 %v97_v15, 0.0 }
  0x9c   :  { %v103_v18 = vadd.f32 %v101_v16, %v99_v17 }
  0x9e   :  { %106 = vst.msk [vmem:[#allocation2 + $0x8] sm:$0xff] %vm80_vm1, %v103_v18 }
  0xa1   :  { %v110_v19 = vld [vmem:[#allocation2] sm:$0xff] }
  0xa2   :  { %v112_v21 = vsel %vm80_vm1, %v110_v19, 0.0 }
  0xa5   :  { %v111_v20 = vld [vmem:[#allocation2 + $0x8] sm:$0xff] }
  0xa6   :  { %v113_v22 = vsel %vm80_vm1, %v111_v20, 0.0 }
  0xa7   :  { %v114_v23 = vadd.f32 %v113_v22, %v112_v21 }
  0xa9   :  { %115 = vadd.xlane.f32.xlu1 %v114_v23 }
 0x136   :  { %v116_v24 = vpop.xlane.xlu1 %115 }
 0x137   :  { %v117_v25 = vrot.slane %v116_v24, 4 }
 0x139   :  { %v118_v26 = vadd.f32 %v117_v25, %v116_v24 }
 0x13b   :  { %v119_v27 = vrot.slane %v118_v26, 2 }
 0x13d   :  { %v120_v28 = vadd.f32 %v119_v27, %v118_v26 }
 0x13f   :  { %v121_v29 = vrot.slane %v120_v28, 1 }
 0x141   :  { %v122_v30 = vadd.f32 %v121_v29, %v120_v28 }
 0x143   :  { %152 = vpush %v122_v30 }
 0x174   :  { %s153_s17 = spop %152 }
 0x175   :  { %v124_v31 = vstv %s153_s17 }
 0x176   :  { %125 = vst [vmem:[#allocation3] sm:$0xff] %v124_v31 }
 0x177   :  { %167 = shalt.err (!%p164_p4)
}
 0x178   :  { %s168_s21 = scalar_lea.hbm %s229_s2, 128 }
 0x179   :  { %p169_p5 = scmp.ne.s32.totalorder %s229_s2, %s168_s21  ;;  %p172_p6 = scmp.lt.u32.totalorder %s168_s21, %s229_s2 }
 0x17b   :  { %p174_p7 = pnand %p172_p6, %p169_p5 }
 0x17d   :  { %177 = shalt.err (!%p174_p7)
}
 0x17e   :  { %135 = dma.vmem_to_hbm [thread:$0]  %s133_s1, 128, %s229_s2, [#allocation4]  }
 0x17f   :  { %178 = dma.done.wait [#allocation4], 128  }
 0x180   :  { %179 = vsyncadd [#allocation4], 4294967168 }
 0x181   :  { %139 = vsyncpa [#allocation4], 1 }

</bundles_post_ra>
